<compile_context>
chip_gen: v5e
topology: v5e:2x2
jax: 0.10.0
libtpu: 0.0.40
codegen_flags: <defaults>
</compile_context>

<pallas_src>
import functools

import jax
import jax.numpy as jnp
from jax import lax
from jax.experimental import pallas as pl
from jax.experimental.pallas import tpu as pltpu


# ---------------------------------------------------------------------------
# Fused kernel: Linear (both halves, one MXU pass) -> all-pairs relu-sum
# excluding self -> mean over neighbors.
# ---------------------------------------------------------------------------
def _pairwise_interactions_kernel(x_ref, w_ref, b_ref, out_ref, *, inv_nb):
    # x_ref:   (tb, n, d_x)    f32  batch tile of point clouds
    # w_ref:   (d_x, 2*d_out)  f32  fused Linear weight, columns = [W_nb | W_self]
    # b_ref:   (1, d_out)      f32
    # out_ref: (tb, n, d_out)  f32
    tb, n, d_x = x_ref.shape
    d_out = out_ref.shape[-1]

    w = w_ref[...]                                   # loaded once per grid step
    bias = b_ref[...]

    # One MXU pass for both Linear halves over the whole batch tile.
    # (n == 8, so (tb, n, d_x) -> (tb*n, d_x) just regroups whole sublane tiles
    #  into the leading dim: a layout no-op.)
    x2 = x_ref[...].reshape(tb * n, d_x)
    h = jnp.dot(x2, w, preferred_element_type=jnp.float32)        # (tb*n, 2*d_out)
    h_nb = h[:, :d_out].reshape(tb, n, d_out)                     # x_j @ W_nb
    h_self = (h[:, d_out:] + bias).reshape(tb, n, d_out)          # x_i @ W_self + b

    # npoints == N  =>  the nearest N-1 neighbors (self excluded) are ALL other
    # points, so no ranking/selection is needed:
    #   out[i] = mean_{j != i} relu(h_self[i] + h_nb[j])
    #          = (sum_j relu(h_self[i] + h_nb[j]) - relu(h_self[i] + h_nb[i])) * inv_nb
    acc = -jnp.maximum(h_self + h_nb, 0.0)            # remove the j == i term up front
    for j in range(n):                                # static unroll, n is tiny (== N)
        acc = acc + jnp.maximum(h_self + h_nb[:, j:j + 1, :], 0.0)

    out_ref[...] = acc * inv_nb                       # single coalesced store per step


# ---------------------------------------------------------------------------
# Grid sizing (generation-aware) and parameter preparation
# ---------------------------------------------------------------------------
def _num_tensorcores_per_device():
    """Best-effort TensorCore count per device.  The grid axis is only sharded
    across TensorCores under dimension_semantics=("parallel",); otherwise it is
    a serial loop, so extra grid steps are pure ~0.35us/step overhead."""
    try:
        kind = jax.devices()[0].device_kind.lower()
    except Exception:
        return 1
    # v7x: 2 TensorCores/chip; v4/v5p megacore: 2 cores per device. v5e/v6e: 1.
    if "v7" in kind or "v4" in kind or "v5p" in kind:
        return 2
    return 1


def _pick_batch_tile(batch, num_cores, max_tile=512):
    """Fewest grid steps that (a) give every TensorCore a step and (b) keep the
    per-step tile <= max_tile (VMEM headroom only matters for huge batches)."""
    for steps in range(1, batch + 1):
        if batch % steps:
            continue
        if steps >= num_cores and batch // steps <= max_tile:
            return batch // steps
    return 1


def prepare_params(W, b, d_x, d_out):
    """Hoisted out of the per-call forward path: fuse the two Linear halves into
    one (d_x, 2*d_out) weight with columns [W_nb | W_self].  W is the
    (2*d_x, d_out) matrix applied to [x_self, x_nb] (i.e. torch weight.T)."""
    W = jnp.asarray(W, jnp.float32)
    w_fused = jnp.concatenate([W[d_x:], W[:d_x]], axis=1)
    b2 = jnp.asarray(b, jnp.float32).reshape(1, d_out)
    return w_fused, b2


def pairwise_interactions_forward(x0_flat, w_fused, b2, *, d_x, d_out, N,
                                  batch_tile=None):
    """x0_flat: (B, N*d_x) f32; w_fused/b2 from prepare_params.
    Returns (B, N*d_out), matching the PyTorch module's flat output."""
    B = x0_flat.shape[0]
    n = N                                            # the module sets npoints = N
    x = x0_flat.reshape(B, n, d_x).astype(jnp.float32)

    tb = (_pick_batch_tile(B, _num_tensorcores_per_device())
          if batch_tile is None else batch_tile)
    assert B % tb == 0, "batch_tile must divide the batch size"

    kernel = functools.partial(_pairwise_interactions_kernel, inv_nb=1.0 / (N - 1))
    out = pl.pallas_call(
        kernel,
        out_shape=jax.ShapeDtypeStruct((B, n, d_out), jnp.float32),
        grid=(B // tb,),
        in_specs=[
            pl.BlockSpec((tb, n, d_x), lambda i: (i, 0, 0)),
            pl.BlockSpec((d_x, 2 * d_out), lambda i: (0, 0)),
            pl.BlockSpec((1, d_out), lambda i: (0, 0)),
        ],
        out_specs=pl.BlockSpec((tb, n, d_out), lambda i: (i, 0, 0)),
        compiler_params=pltpu.CompilerParams(dimension_semantics=("parallel",)),
    )(x, w_fused, b2)

    # Free reshape to the flat (B, npoints*d_out) layout the PyTorch module returns.
    return out.reshape(B, n * d_out)


# ---------------------------------------------------------------------------
# Pure-JAX reference (mirrors the PyTorch forward) for the correctness check
# ---------------------------------------------------------------------------
def reference_forward(x0_flat, W, b, d_x, d_out, N):
    B = x0_flat.shape[0]
    x = x0_flat.reshape(B, N, d_x)
    diff = x[:, :, None, :] - x[:, None, :, :]
    dist = jnp.sqrt(jnp.sum(diff * diff, -1))
    _, idx = lax.top_k(-dist, N)                               # smallest-N, sorted
    idx = idx[:, :, 1:]                                        # drop self
    x_nb = x[jnp.arange(B)[:, None, None], idx]                # (B, N, N-1, d)
    x_self = jnp.broadcast_to(x[:, :, None, :], x_nb.shape)
    feats = jnp.concatenate([x_self, x_nb], axis=-1)           # (B, N, N-1, 2d)
    h = jnp.maximum(feats @ W + b, 0.0)
    out = jnp.sum(h, axis=2) / (N - 1)
    return out.reshape(B, N * d_out)


if __name__ == "__main__":
    d_x, d_out, N = 4, 32, 8
    B = 2

    key = jax.random.PRNGKey(0)
    kx, kw, kb = jax.random.split(key, 3)

    # input: flat point clouds, (B, npoints*d_x) just like the PyTorch module
    x0 = jax.random.normal(kx, (B, N * d_x), dtype=jnp.float32)

    # deterministic Linear(2*d_x, d_out) params (PyTorch-style uniform init)
    bound = float(1.0 / (2 * d_x) ** 0.5)
    W = jax.random.uniform(kw, (2 * d_x, d_out), jnp.float32, -bound, bound)
    b = jax.random.uniform(kb, (d_out,), jnp.float32, -bound, bound)

    # Build fused params once (outside the forward path), then run the kernel.
    w_fused, b2 = prepare_params(W, b, d_x, d_out)
    fwd = jax.jit(functools.partial(pairwise_interactions_forward,
                                    d_x=d_x, d_out=d_out, N=N))
    out = jax.block_until_ready(fwd(x0, w_fused, b2))

    ref = reference_forward(x0, W, b, d_x, d_out, N)
    assert out.shape == (B, N * d_out)
    assert jnp.allclose(out, ref, atol=1e-4, rtol=1e-4), "mismatch vs reference"

    print("KERNEL_OK")
</pallas_src>

<mosaic_0001>
module attributes {stable_mosaic.version = 11 : i64} {
  func.func @_pairwise_interactions_kernel(%arg0: i32, %arg1: memref<2x8x4xf32, #tpu.memory_space<vmem>>, %arg2: memref<4x64xf32, #tpu.memory_space<vmem>>, %arg3: memref<1x32xf32, #tpu.memory_space<vmem>>, %arg4: memref<2x8x32xf32, #tpu.memory_space<vmem>>) attributes {dimension_semantics = [#tpu.dimension_semantics<parallel>], iteration_bounds = array<i64: 1>, scalar_prefetch = 0 : i64, scratch_operands = 0 : i64, tpu.core_type = #tpu.core_type<tc>, window_params = [{transform_indices = @transform_0, window_bounds = array<i64: 2, 8, 4>}, {pipeline_mode = #tpu.pipeline_mode<synchronous>, transform_indices = @transform_1, window_bounds = array<i64: 4, 64>}, {pipeline_mode = #tpu.pipeline_mode<synchronous>, transform_indices = @transform_2, window_bounds = array<i64: 1, 32>}, {transform_indices = @transform_3, window_bounds = array<i64: 2, 8, 32>}]} {
    %c0 = arith.constant 0 : index
    %c0_0 = arith.constant 0 : index
    %0 = vector.load %arg2[%c0, %c0_0] : memref<4x64xf32, #tpu.memory_space<vmem>>, vector<4x64xf32>
    %c0_1 = arith.constant 0 : index
    %c0_2 = arith.constant 0 : index
    %1 = vector.load %arg3[%c0_1, %c0_2] : memref<1x32xf32, #tpu.memory_space<vmem>>, vector<1x32xf32>
    %c0_3 = arith.constant 0 : index
    %c0_4 = arith.constant 0 : index
    %c0_5 = arith.constant 0 : index
    %2 = vector.load %arg1[%c0_3, %c0_4, %c0_5] : memref<2x8x4xf32, #tpu.memory_space<vmem>>, vector<2x8x4xf32>
    %3 = vector.shape_cast %2 : vector<2x8x4xf32> to vector<16x4xf32>
    %cst = arith.constant dense<0.000000e+00> : vector<16x64xf32>
    %4 = tpu.matmul %3, %0, %cst {dimension_numbers = #tpu.dot_dimension_numbers<[1], [0], [0], [1], [0, 0, 1, 1], [], []>} : vector<16x4xf32>, vector<4x64xf32>, vector<16x64xf32> -> vector<16x64xf32>
    %5 = vector.extract_strided_slice %4 {offsets = [0, 0], sizes = [16, 32], strides = [1, 1]} : vector<16x64xf32> to vector<16x32xf32>
    %6 = vector.shape_cast %5 : vector<16x32xf32> to vector<2x8x32xf32>
    %7 = vector.extract_strided_slice %4 {offsets = [0, 32], sizes = [16, 32], strides = [1, 1]} : vector<16x64xf32> to vector<16x32xf32>
    %8 = vector.broadcast %1 : vector<1x32xf32> to vector<16x32xf32>
    %9 = arith.addf %7, %8 : vector<16x32xf32>
    %10 = vector.shape_cast %9 : vector<16x32xf32> to vector<2x8x32xf32>
    %11 = arith.addf %10, %6 : vector<2x8x32xf32>
    %cst_6 = arith.constant 0.000000e+00 : f32
    %12 = vector.broadcast %cst_6 : f32 to vector<2x8x32xf32>
    %13 = arith.maximumf %11, %12 : vector<2x8x32xf32>
    %cst_7 = arith.constant 0.000000e+00 : f32
    %14 = vector.broadcast %cst_7 : f32 to vector<2x8x32xf32>
    %15 = arith.subf %14, %13 : vector<2x8x32xf32>
    %16 = vector.extract_strided_slice %6 {offsets = [0, 0, 0], sizes = [2, 1, 32], strides = [1, 1, 1]} : vector<2x8x32xf32> to vector<2x1x32xf32>
    %17 = vector.broadcast %16 : vector<2x1x32xf32> to vector<2x8x32xf32>
    %18 = arith.addf %10, %17 : vector<2x8x32xf32>
    %cst_8 = arith.constant 0.000000e+00 : f32
    %19 = vector.broadcast %cst_8 : f32 to vector<2x8x32xf32>
    %20 = arith.maximumf %18, %19 : vector<2x8x32xf32>
    %21 = arith.addf %15, %20 : vector<2x8x32xf32>
    %22 = vector.extract_strided_slice %6 {offsets = [0, 1, 0], sizes = [2, 1, 32], strides = [1, 1, 1]} : vector<2x8x32xf32> to vector<2x1x32xf32>
    %23 = vector.broadcast %22 : vector<2x1x32xf32> to vector<2x8x32xf32>
    %24 = arith.addf %10, %23 : vector<2x8x32xf32>
    %cst_9 = arith.constant 0.000000e+00 : f32
    %25 = vector.broadcast %cst_9 : f32 to vector<2x8x32xf32>
    %26 = arith.maximumf %24, %25 : vector<2x8x32xf32>
    %27 = arith.addf %21, %26 : vector<2x8x32xf32>
    %28 = vector.extract_strided_slice %6 {offsets = [0, 2, 0], sizes = [2, 1, 32], strides = [1, 1, 1]} : vector<2x8x32xf32> to vector<2x1x32xf32>
    %29 = vector.broadcast %28 : vector<2x1x32xf32> to vector<2x8x32xf32>
    %30 = arith.addf %10, %29 : vector<2x8x32xf32>
    %cst_10 = arith.constant 0.000000e+00 : f32
    %31 = vector.broadcast %cst_10 : f32 to vector<2x8x32xf32>
    %32 = arith.maximumf %30, %31 : vector<2x8x32xf32>
    %33 = arith.addf %27, %32 : vector<2x8x32xf32>
    %34 = vector.extract_strided_slice %6 {offsets = [0, 3, 0], sizes = [2, 1, 32], strides = [1, 1, 1]} : vector<2x8x32xf32> to vector<2x1x32xf32>
    %35 = vector.broadcast %34 : vector<2x1x32xf32> to vector<2x8x32xf32>
    %36 = arith.addf %10, %35 : vector<2x8x32xf32>
    %cst_11 = arith.constant 0.000000e+00 : f32
    %37 = vector.broadcast %cst_11 : f32 to vector<2x8x32xf32>
    %38 = arith.maximumf %36, %37 : vector<2x8x32xf32>
    %39 = arith.addf %33, %38 : vector<2x8x32xf32>
    %40 = vector.extract_strided_slice %6 {offsets = [0, 4, 0], sizes = [2, 1, 32], strides = [1, 1, 1]} : vector<2x8x32xf32> to vector<2x1x32xf32>
    %41 = vector.broadcast %40 : vector<2x1x32xf32> to vector<2x8x32xf32>
    %42 = arith.addf %10, %41 : vector<2x8x32xf32>
    %cst_12 = arith.constant 0.000000e+00 : f32
    %43 = vector.broadcast %cst_12 : f32 to vector<2x8x32xf32>
    %44 = arith.maximumf %42, %43 : vector<2x8x32xf32>
    %45 = arith.addf %39, %44 : vector<2x8x32xf32>
    %46 = vector.extract_strided_slice %6 {offsets = [0, 5, 0], sizes = [2, 1, 32], strides = [1, 1, 1]} : vector<2x8x32xf32> to vector<2x1x32xf32>
    %47 = vector.broadcast %46 : vector<2x1x32xf32> to vector<2x8x32xf32>
    %48 = arith.addf %10, %47 : vector<2x8x32xf32>
    %cst_13 = arith.constant 0.000000e+00 : f32
    %49 = vector.broadcast %cst_13 : f32 to vector<2x8x32xf32>
    %50 = arith.maximumf %48, %49 : vector<2x8x32xf32>
    %51 = arith.addf %45, %50 : vector<2x8x32xf32>
    %52 = vector.extract_strided_slice %6 {offsets = [0, 6, 0], sizes = [2, 1, 32], strides = [1, 1, 1]} : vector<2x8x32xf32> to vector<2x1x32xf32>
    %53 = vector.broadcast %52 : vector<2x1x32xf32> to vector<2x8x32xf32>
    %54 = arith.addf %10, %53 : vector<2x8x32xf32>
    %cst_14 = arith.constant 0.000000e+00 : f32
    %55 = vector.broadcast %cst_14 : f32 to vector<2x8x32xf32>
    %56 = arith.maximumf %54, %55 : vector<2x8x32xf32>
    %57 = arith.addf %51, %56 : vector<2x8x32xf32>
    %58 = vector.extract_strided_slice %6 {offsets = [0, 7, 0], sizes = [2, 1, 32], strides = [1, 1, 1]} : vector<2x8x32xf32> to vector<2x1x32xf32>
    %59 = vector.broadcast %58 : vector<2x1x32xf32> to vector<2x8x32xf32>
    %60 = arith.addf %10, %59 : vector<2x8x32xf32>
    %cst_15 = arith.constant 0.000000e+00 : f32
    %61 = vector.broadcast %cst_15 : f32 to vector<2x8x32xf32>
    %62 = arith.maximumf %60, %61 : vector<2x8x32xf32>
    %63 = arith.addf %57, %62 : vector<2x8x32xf32>
    %cst_16 = arith.constant 0.142857149 : f32
    %64 = vector.broadcast %cst_16 : f32 to vector<2x8x32xf32>
    %65 = arith.mulf %63, %64 : vector<2x8x32xf32>
    %c0_17 = arith.constant 0 : index
    %c0_18 = arith.constant 0 : index
    %c0_19 = arith.constant 0 : index
    %66 = vector.load %arg4[%c0_17, %c0_18, %c0_19] : memref<2x8x32xf32, #tpu.memory_space<vmem>>, vector<2x8x32xf32>
    tpu.vector_store %arg4[%c0_17, %c0_18, %c0_19], %65 {strides = array<i32>} : memref<2x8x32xf32, #tpu.memory_space<vmem>>, vector<2x8x32xf32>,
    return
  }
  func.func @transform_0(%arg0: i32) -> (i32, i32, i32) {
    %c0_i32 = arith.constant 0 : i32
    %c0_i32_0 = arith.constant 0 : i32
    %c0_i32_1 = arith.constant 0 : i32
    return %arg0, %c0_i32, %c0_i32_0 : i32, i32, i32
  }
  func.func @transform_1(%arg0: i32) -> (i32, i32) {
    %c0_i32 = arith.constant 0 : i32
    %c0_i32_0 = arith.constant 0 : i32
    %c0_i32_1 = arith.constant 0 : i32
    return %c0_i32, %c0_i32_0 : i32, i32
  }
  func.func @transform_2(%arg0: i32) -> (i32, i32) {
    %c0_i32 = arith.constant 0 : i32
    %c0_i32_0 = arith.constant 0 : i32
    %c0_i32_1 = arith.constant 0 : i32
    return %c0_i32, %c0_i32_0 : i32, i32
  }
  func.func @transform_3(%arg0: i32) -> (i32, i32, i32) {
    %c0_i32 = arith.constant 0 : i32
    %c0_i32_0 = arith.constant 0 : i32
    %c0_i32_1 = arith.constant 0 : i32
    return %arg0, %c0_i32, %c0_i32_0 : i32, i32, i32
  }
}

</mosaic_0001>

<bundles_post_ra>
// kernel: pairwise_interactions_forward.1
= control target key start
LH: loop header
LB: loop body
LE: loop exit
PB: predicated region body
PF: predicated region fallthrough
CT: control target
= control target key end

     0   :  { %vm25_vm0 = vcmask 1043456   ;;  %vm18_vm1 = vcmask 31744   ;;  %s225_s20 = smov 32   ;;  %vm211_vm2 = vcmask 261120   ;;  %s284_s1 = inlined_call_operand.vmem [shape: f32[4,64], index: 1, kind: input, shape index: {}]   ;;  %s285_s0 = inlined_call_operand.vmem [shape: f32[2,8,4], index: 0, kind: input, shape index: {}]   ;;  %s286_s2 = inlined_call_operand.vmem [shape: f32[1,32], index: 2, kind: input, shape index: {}]   ;;  %s287_s3 = inlined_call_operand.vmem [shape: f32[2,8,32], index: 3, kind: output, shape index: {}]  }
   0x1   :  { %v14_v0 = vld [vmem:[%s284_s1] sm:$0xf]  ;;  %v17_v2 = vld [vmem:[%s285_s0 + $0x8] sm:$0xff] }
   0x2   :  { %v16_v1 = vld [vmem:[%s285_s0] sm:$0xff]  ;;  %218 = vmatpush.msk.msra.mxu0 %vm25_vm0, %v14_v0  ;;  %221 = vmatpush.msk.msra.mxu1 %vm25_vm0, %v14_v0  ;;  %s226_s0 = smov 96  }
   0x3   :  { %v224_v3 = vld [vmem:[%s286_s2] ss:$0 sm:$0xff]  ;;  %219 = vmatmul.msk.f32.vlgmr.msra.gmra.mxu0 %vm18_vm1, %v16_v1  ;;  %220 = vmatmul.msk.f32.vlgmr.msra.gmra.mxu1 %vm18_vm1, %v17_v2 }
   0x4   :  { %54 = vrot.lane.b32.xlu0 %v224_v3, %s225_s20 }
  0x76   :  { %v55_v24 = vpop.permute.xlu0 %54 }
  0x80   :  { %v46_v4 = vpop.f32.mrf.mxu0  ;;  %v49_v5 = vpop.f32.mrf.mxu1 }
  0x81   :  { %63 = vrot.lane.b32.xlu1 %v49_v5, %s225_s20  ;;  %61 = vrot.lane.b32.xlu0 %v46_v4, %s225_s20  ;;  %v74_v6 = vperm.slane %v49_v5, 0  ;;  %v90_v7 = vperm.slane %v49_v5, 1  ;;  %v73_v8 = vperm.slane %v46_v4, 0  ;;  %v89_v9 = vperm.slane %v46_v4, 1 }
  0x82   :  { %v121_v10 = vperm.slane %v46_v4, 3  ;;  %v105_v11 = vperm.slane %v46_v4, 2  ;;  %v106_v12 = vperm.slane %v49_v5, 2  ;;  %v138_v13 = vperm.slane %v49_v5, 4 }
  0x83   :  { %79 = vrot.lane.b32.xlu2 %v74_v6, %s225_s20  ;;  %v122_v14 = vperm.slane %v49_v5, 3  ;;  %v137_v15 = vperm.slane %v46_v4, 4  ;;  %v169_v16 = vperm.slane %v46_v4, 6  ;;  %v153_v17 = vperm.slane %v46_v4, 5 }
  0x84   :  { %v154_v18 = vperm.slane %v49_v5, 5  ;;  %v186_v19 = vperm.slane %v49_v5, 7  ;;  %v170_v20 = vperm.slane %v49_v5, 6  ;;  %v185_v21 = vperm.slane %v46_v4, 7 }
  0x85   :  { %v57_v30 = vadd.f32 %v55_v24, %v46_v4  ;;  %v58_v33 = vadd.f32 %v55_v24, %v49_v5 }
  0x89   :  { %95 = vrot.lane.b32.xlu0 %v90_v7, %s225_s20  ;;  %77 = vrot.lane.b32.xlu1 %v73_v8, %s225_s20 }
  0x8b   :  { %93 = vrot.lane.b32.xlu2 %v89_v9, %s225_s20 }
  0x91   :  { %125 = vrot.lane.b32.xlu0 %v121_v10, %s225_s20  ;;  %109 = vrot.lane.b32.xlu1 %v105_v11, %s225_s20 }
  0x93   :  { %111 = vrot.lane.b32.xlu2 %v106_v12, %s225_s20 }
  0x99   :  { %143 = vrot.lane.b32.xlu0 %v138_v13, %s225_s20  ;;  %127 = vrot.lane.b32.xlu1 %v122_v14, %s225_s20 }
  0x9b   :  { %141 = vrot.lane.b32.xlu2 %v137_v15, %s225_s20 }
  0xa1   :  { %173 = vrot.lane.b32.xlu0 %v169_v16, %s225_s20  ;;  %157 = vrot.lane.b32.xlu1 %v153_v17, %s225_s20 }
  0xa3   :  { %159 = vrot.lane.b32.xlu2 %v154_v18, %s225_s20 }
  0xa9   :  { %191 = vrot.lane.b32.xlu0 %v186_v19, %s225_s20  ;;  %175 = vrot.lane.b32.xlu1 %v170_v20, %s225_s20 }
  0xab   :  { %189 = vrot.lane.b32.xlu2 %v185_v21, %s225_s20 }
  0xdd   :  { %v80_v22 = vpop.permute.xlu2 %79 }
  0xde   :  { %v84_v44 = vadd.f32 %v80_v22, %v58_v33 }
  0xe0   :  { %v86_v53 = vmax.f32 %v84_v44, 0.0 }
  0xe5   :  { %v94_v23 = vpop.permute.xlu2 %93 }
  0xe6   :  { %v99_v40 = vadd.f32 %v94_v23, %v57_v30 }
  0xe8   :  { %v101_v48 = vmax.f32 %v99_v40, 0.0 }
  0xed   :  { %v112_v27 = vpop.permute.xlu2 %111 }
  0xee   :  { %v116_v57 = vadd.f32 %v112_v27, %v58_v33 }
  0xf0   :  { %v118_v0 = vmax.f32 %v116_v57, 0.0 }
  0xf3   :  { %v64_v25 = vpop.permute.xlu1 %63  ;;  %v62_v26 = vpop.permute.xlu0 %61 }
  0xf4   :  { %v67_v31 = vadd.f32 %v62_v26, %v57_v30  ;;  %v68_v35 = vadd.f32 %v64_v25, %v58_v33 }
  0xf5   :  { %v142_v32 = vpop.permute.xlu2 %141 }
  0xf6   :  { %v69_v36 = vmax.f32 %v67_v31, 0.0  ;;  %v70_v41 = vmax.f32 %v68_v35, 0.0  ;;  %v147_v61 = vadd.f32 %v142_v32, %v57_v30 }
  0xf8   :  { %v71_v42 = vsub.f32 0.0, %v69_v36  ;;  %v72_v49 = vsub.f32 0.0, %v70_v41  ;;  %v149_v4 = vmax.f32 %v147_v61, 0.0 }
  0xfa   :  { %v88_v58 = vadd.f32 %v86_v53, %v72_v49 }
  0xfb   :  { %v96_v28 = vpop.permute.xlu0 %95  ;;  %v78_v29 = vpop.permute.xlu1 %77 }
  0xfc   :  { %v83_v34 = vadd.f32 %v78_v29, %v57_v30  ;;  %v100_v45 = vadd.f32 %v96_v28, %v58_v33 }
  0xfd   :  { %v160_v47 = vpop.permute.xlu2 %159 }
  0xfe   :  { %v85_v39 = vmax.f32 %v83_v34, 0.0  ;;  %v102_v54 = vmax.f32 %v100_v45, 0.0  ;;  %v164_v15 = vadd.f32 %v160_v47, %v58_v33 }
 0x100   :  { %v87_v46 = vadd.f32 %v85_v39, %v71_v42  ;;  %v104_v62 = vadd.f32 %v102_v54, %v88_v58  ;;  %v166_v24 = vmax.f32 %v164_v15, 0.0 }
 0x102   :  { %v103_v56 = vadd.f32 %v101_v48, %v87_v46  ;;  %v120_v8 = vadd.f32 %v118_v0, %v104_v62 }
 0x103   :  { %v126_v37 = vpop.permute.xlu0 %125  ;;  %v110_v38 = vpop.permute.xlu1 %109 }
 0x104   :  { %v115_v43 = vadd.f32 %v110_v38, %v57_v30  ;;  %v131_v55 = vadd.f32 %v126_v37, %v57_v30 }
 0x105   :  { %v190_v2 = vpop.permute.xlu2 %189 }
 0x106   :  { %v117_v50 = vmax.f32 %v115_v43, 0.0  ;;  %v133_v63 = vmax.f32 %v131_v55, 0.0  ;;  %v195_v11 = vadd.f32 %v190_v2, %v57_v30 }
 0x108   :  { %v119_v59 = vadd.f32 %v117_v50, %v103_v56  ;;  %v197_v19 = vmax.f32 %v195_v11, 0.0 }
 0x10a   :  { %v135_v1 = vadd.f32 %v133_v63, %v119_v59 }
 0x10b   :  { %v144_v51 = vpop.permute.xlu0 %143  ;;  %v128_v52 = vpop.permute.xlu1 %127 }
 0x10c   :  { %v132_v60 = vadd.f32 %v128_v52, %v58_v33  ;;  %v148_v7 = vadd.f32 %v144_v51, %v58_v33  ;;  %v151_v13 = vadd.f32 %v149_v4, %v135_v1 }
 0x10e   :  { %v134_v3 = vmax.f32 %v132_v60, 0.0  ;;  %v150_v16 = vmax.f32 %v148_v7, 0.0 }
 0x110   :  { %v136_v12 = vadd.f32 %v134_v3, %v120_v8 }
 0x112   :  { %v152_v20 = vadd.f32 %v150_v16, %v136_v12 }
 0x113   :  { %v174_v5 = vpop.permute.xlu0 %173  ;;  %v158_v6 = vpop.permute.xlu1 %157 }
 0x114   :  { %v179_v9 = vadd.f32 %v174_v5, %v57_v30  ;;  %v163_v10 = vadd.f32 %v158_v6, %v57_v30  ;;  %v168_v28 = vadd.f32 %v166_v24, %v152_v20 }
 0x116   :  { %v165_v14 = vmax.f32 %v163_v10, 0.0  ;;  %v181_v17 = vmax.f32 %v179_v9, 0.0 }
 0x118   :  { %v167_v18 = vadd.f32 %v165_v14, %v151_v13 }
 0x11a   :  { %v183_v21 = vadd.f32 %v181_v17, %v167_v18 }
 0x11b   :  { %v192_v22 = vpop.permute.xlu0 %191  ;;  %v176_v23 = vpop.permute.xlu1 %175 }
 0x11c   :  { %v196_v25 = vadd.f32 %v192_v22, %v58_v33  ;;  %v180_v26 = vadd.f32 %v176_v23, %v58_v33  ;;  %v199_v27 = vadd.f32 %v197_v19, %v183_v21 }
 0x11e   :  { %v182_v29 = vmax.f32 %v180_v26, 0.0  ;;  %v201_v31 = vmul.f32 0.14285715, %v199_v27  ;;  %v198_v30 = vmax.f32 %v196_v25, 0.0 }
 0x120   :  { %v184_v32 = vadd.f32 %v182_v29, %v168_v28  ;;  %205 = vrot.lane.b32.xlu1 %v201_v31, %s226_s0 }
 0x122   :  { %v200_v34 = vadd.f32 %v198_v30, %v184_v32 }
 0x124   :  { %v202_v35 = vmul.f32 0.14285715, %v200_v34 }
 0x126   :  { %207 = vrot.lane.b32.xlu2 %v202_v35, %s226_s0 }
 0x180   :  { %v208_v36 = vpop.permute.xlu2 %207 }
 0x181   :  { %213 = vst.msk [vmem:[%s287_s3 + $0x8] sm:$0xff] %vm211_vm2, %v208_v36 }
 0x192   :  { %v206_v37 = vpop.permute.xlu1 %205 }
 0x193   :  { %212 = vst.msk [vmem:[%s287_s3] sm:$0xff] %vm211_vm2, %v206_v37 }

</bundles_post_ra>
